<compile_context>
chip_gen: v7x
topology: tpu7x:2x2x1
jax: 0.10.0
libtpu: 0.0.40
codegen_flags: <defaults>
</compile_context>

<pallas_src>
import math
import functools

import jax
import jax.numpy as jnp
from jax.experimental import pallas as pl
from jax.experimental.pallas import tpu as pltpu


def _vmem_capacity_bytes() -> int:
    """Physical per-core VMEM (generation-aware), with a conservative fallback."""
    try:
        return int(pltpu.get_tpu_info().vmem_capacity_bytes)
    except Exception:
        return 64 << 20          # v7x per-TensorCore size (smallest current gen)


_VMEM_CAP = _vmem_capacity_bytes()
# Per-buffer tile target: ~4 MiB on v7x (64 MiB VMEM), ~8 MiB on v5e/v6e
# (128 MiB).  Big enough that the ~0.35 us per-grid-step pipeline overhead is
# <10% of the HBM-bound step time; 3 arrays x 2 buffers stays under the limit.
_TILE_BYTES = max(2 << 20, min(8 << 20, _VMEM_CAP // 16))
_VMEM_LIMIT = min(_VMEM_CAP * 3 // 4, 100 << 20)


def make_positional_encoding_table(d_model: int, max_len: int = 5000,
                                   dtype=jnp.float32) -> jnp.ndarray:
    """Builds the [max_len, d_model] sin/cos table exactly like the PyTorch __init__.

    Build it once, in the dtype you want it stored in (no per-call conversion).
    """
    position = jnp.arange(max_len, dtype=jnp.float32)[:, None]              # [max_len, 1]
    div_term = jnp.exp(
        -jnp.arange(0, d_model, 2, dtype=jnp.float32) * (math.log(10000.0) / d_model)
    )                                                                        # [d_model//2]
    angles = position * div_term                                             # [max_len, d_model//2]
    pe = jnp.zeros((max_len, d_model), dtype=jnp.float32)
    pe = pe.at[:, 0::2].set(jnp.sin(angles))
    pe = pe.at[:, 1::2].set(jnp.cos(angles))
    return pe.astype(dtype)


def _pos_enc_kernel(x_ref, pe_ref, o_ref, *, scale: float):
    # Compute in f32 regardless of activation/table dtype (free: the kernel is
    # HBM-bound with idle VALU slots) and cast only on the store.
    x = x_ref[...].astype(jnp.float32)
    pe = pe_ref[...].astype(jnp.float32)
    o_ref[...] = (x * scale + pe).astype(o_ref.dtype)


def _largest_divisor_leq(n: int, cap: int) -> int:
    """Largest d with d | n and 1 <= d <= cap (trace-time, n <= max_len)."""
    d = min(n, max(1, cap))
    while n % d:
        d -= 1
    return d


def positional_encoding(x: jnp.ndarray, pe_table: jnp.ndarray, d_model: int) -> jnp.ndarray:
    """out = x * sqrt(d_model) + pe[:S]   (x: [B, S, D])"""
    B, S, D = x.shape
    assert D == d_model
    max_len = pe_table.shape[0]
    assert S <= max_len, f"sequence length {S} exceeds max_len {max_len}"

    kernel = functools.partial(_pos_enc_kernel, scale=math.sqrt(d_model))
    itemsize = jnp.dtype(x.dtype).itemsize
    pe_itemsize = jnp.dtype(pe_table.dtype).itemsize
    sub = max(8, 32 // itemsize)     # packed sublane count: 8 f32 / 16 bf16 / 32 int8

    # Advisory cost: pe is effectively read once (its DMA is elided across the
    # inner batch axis after the grid reorder below).
    cost = pl.CostEstimate(
        flops=2 * B * S * D,
        transcendentals=0,
        bytes_accessed=2 * B * S * D * itemsize + S * D * pe_itemsize)

    if (D % 128 == 0) and (S % sub == 0):
        # Lane-dense [B, S, D] path.  Grid = (S/ts, B): seq-tile axis OUTER
        # ("parallel", core-split on v7x), batch INNER ("arbitrary") so the pe
        # block index is constant across the inner loop and its fetch is elided.
        m = S // sub
        budget = max(1, _TILE_BYTES // (D * itemsize * sub))   # row budget, in units of sub
        d = _largest_divisor_leq(m, budget)
        if d == m and m >= 2:
            # Guarantee >= 2 blocks on the leading parallel axis (both v7x TCs busy).
            d = _largest_divisor_leq(m, m // 2)
        ts = d * sub                  # ts divides S exactly -> no clamped tail blocks,
        n_s = S // ts                 # so pe (read from the full [max_len, D] table)
                                      # can never mis-align with x / out blocks.
        return pl.pallas_call(
            kernel,
            out_shape=jax.ShapeDtypeStruct((B, S, D), x.dtype),
            grid_spec=pltpu.PrefetchScalarGridSpec(
                num_scalar_prefetch=0,
                grid=(n_s, B),
                in_specs=[
                    pl.BlockSpec((pl.Squeezed(), ts, D), lambda s, b: (b, s, 0)),
                    pl.BlockSpec((ts, D), lambda s, b: (s, 0)),   # full table, tile-indexed
                ],
                out_specs=pl.BlockSpec((pl.Squeezed(), ts, D), lambda s, b: (b, s, 0)),
            ),
            compiler_params=pltpu.CompilerParams(
                dimension_semantics=("parallel", "arbitrary"),
                vmem_limit_bytes=_VMEM_LIMIT),
            cost_estimate=cost,
        )(x, pe_table)

    # Fallback for D not a multiple of 128 (e.g. the toy d_model=32): flatten
    # (S, D) -> S*D so the last dim is lane-dense and stores are unmasked.
    F = S * D
    x2 = x.reshape(B, F)
    pe2 = pe_table[:S].reshape(1, F)
    # TODO(synk): for small B the (tb, tl)/(1, tl) blocks under-fill sublanes;
    # folding sequence chunks into the row dim (and tiling pe to match) would
    # restore full vreg density, but isn't worth the complexity for this path.

    tb = B if B < sub else sub
    # Cap tl so the sublane-padded (1, tl) pe buffer also stays ~<= _TILE_BYTES.
    tl_budget = max(128, (_TILE_BYTES // (max(tb, 8) * itemsize)) // 128 * 128)
    tl = F if F < 128 else min(tl_budget, (F // 128) * 128)
    # Lane-tile axis OUTER so pe's (0, t) block index is constant across the
    # inner batch axis and its DMA is elided (same mechanism as the main path).
    grid = (pl.cdiv(F, tl), pl.cdiv(B, tb))

    out2 = pl.pallas_call(
        kernel,
        out_shape=jax.ShapeDtypeStruct((B, F), x.dtype),
        grid_spec=pltpu.PrefetchScalarGridSpec(
            num_scalar_prefetch=0,
            grid=grid,
            in_specs=[
                pl.BlockSpec((tb, tl), lambda t, b: (b, t)),
                pl.BlockSpec((1, tl), lambda t, b: (0, t)),   # pe broadcast over batch rows
            ],
            out_specs=pl.BlockSpec((tb, tl), lambda t, b: (b, t)),
        ),
        compiler_params=pltpu.CompilerParams(
            dimension_semantics=("parallel", "arbitrary"),
            vmem_limit_bytes=_VMEM_LIMIT),
        cost_estimate=cost,
    )(x2, pe2)
    return out2.reshape(B, S, D)


if __name__ == "__main__":
    MAX_LEN = 5000
    key = jax.random.PRNGKey(0)
    k1, k2, k3 = jax.random.split(key, 3)

    # Case 1 — module-scale toy shapes (batch=2, seq=8, d_model=32): flattened lane-dense path.
    B, S, D = 2, 8, 32
    x = jax.random.normal(k1, (B, S, D), dtype=jnp.float32)
    pe_table = make_positional_encoding_table(D, MAX_LEN)
    out = jax.block_until_ready(positional_encoding(x, pe_table, D))
    ref = x * math.sqrt(D) + pe_table[None, :S, :]
    assert out.shape == (B, S, D)
    assert jnp.allclose(out, ref, atol=1e-5, rtol=1e-5)

    # Case 2 — d_model multiple of 128: sequence-tiled [B, S, D] path (pe resident across batch).
    B2, S2, D2 = 2, 16, 128
    x2 = jax.random.normal(k2, (B2, S2, D2), dtype=jnp.float32)
    pe_table2 = make_positional_encoding_table(D2, MAX_LEN)
    out2 = jax.block_until_ready(positional_encoding(x2, pe_table2, D2))
    ref2 = x2 * math.sqrt(D2) + pe_table2[None, :S2, :]
    assert out2.shape == (B2, S2, D2)
    assert jnp.allclose(out2, ref2, atol=1e-5, rtol=1e-5)

    # Case 3 — bf16 activations with the f32 pe buffer (no full-table cast; f32 compute in-kernel).
    B3, S3, D3 = 2, 32, 128
    x3 = jax.random.normal(k3, (B3, S3, D3), dtype=jnp.float32).astype(jnp.bfloat16)
    out3 = jax.block_until_ready(positional_encoding(x3, pe_table2, D3))
    ref3 = (x3.astype(jnp.float32) * math.sqrt(D3)
            + pe_table2[None, :S3, :]).astype(jnp.bfloat16)
    assert out3.shape == (B3, S3, D3)
    assert jnp.allclose(out3.astype(jnp.float32), ref3.astype(jnp.float32),
                        atol=2e-2, rtol=2e-2)

    print("KERNEL_OK")
</pallas_src>

<mosaic_0001>
module attributes {stable_mosaic.version = 11 : i64} {
  func.func @_pos_enc_kernel(%arg0: i32, %arg1: i32, %arg2: memref<2x256xf32, #tpu.memory_space<vmem>>, %arg3: memref<1x256xf32, #tpu.memory_space<vmem>>, %arg4: memref<2x256xf32, #tpu.memory_space<vmem>>) attributes {dimension_semantics = [#tpu.dimension_semantics<parallel>, #tpu.dimension_semantics<arbitrary>], iteration_bounds = array<i64: 1, 1>, scalar_prefetch = 0 : i64, scratch_operands = 0 : i64, tpu.core_type = #tpu.core_type<tc>, window_params = [{transform_indices = @transform_0, window_bounds = array<i64: 2, 256>}, {transform_indices = @transform_1, window_bounds = array<i64: 1, 256>}, {transform_indices = @transform_2, window_bounds = array<i64: 2, 256>}]} {
    %c0 = arith.constant 0 : index
    %c0_0 = arith.constant 0 : index
    %0 = vector.load %arg2[%c0, %c0_0] : memref<2x256xf32, #tpu.memory_space<vmem>>, vector<2x256xf32>
    %c0_1 = arith.constant 0 : index
    %c0_2 = arith.constant 0 : index
    %1 = vector.load %arg3[%c0_1, %c0_2] : memref<1x256xf32, #tpu.memory_space<vmem>>, vector<1x256xf32>
    %cst = arith.constant 5.65685415 : f32
    %2 = vector.broadcast %cst : f32 to vector<2x256xf32>
    %3 = arith.mulf %0, %2 : vector<2x256xf32>
    %4 = vector.broadcast %1 : vector<1x256xf32> to vector<2x256xf32>
    %5 = arith.addf %3, %4 : vector<2x256xf32>
    %c0_3 = arith.constant 0 : index
    %c0_4 = arith.constant 0 : index
    %6 = vector.load %arg4[%c0_3, %c0_4] : memref<2x256xf32, #tpu.memory_space<vmem>>, vector<2x256xf32>
    tpu.vector_store %arg4[%c0_3, %c0_4], %5 {strides = array<i32>} : memref<2x256xf32, #tpu.memory_space<vmem>>, vector<2x256xf32>,
    return
  }
  func.func @transform_0(%arg0: i32, %arg1: i32) -> (i32, i32) {
    %c0_i32 = arith.constant 0 : i32
    return %arg1, %arg0 : i32, i32
  }
  func.func @transform_1(%arg0: i32, %arg1: i32) -> (i32, i32) {
    %c0_i32 = arith.constant 0 : i32
    %c0_i32_0 = arith.constant 0 : i32
    return %c0_i32, %arg0 : i32, i32
  }
  func.func @transform_2(%arg0: i32, %arg1: i32) -> (i32, i32) {
    %c0_i32 = arith.constant 0 : i32
    return %arg1, %arg0 : i32, i32
  }
}

</mosaic_0001>

<bundles_post_ra>
// kernel: tpu_custom_call.1
= control target key start
LH: loop header
LB: loop body
LE: loop exit
PB: predicated region body
PF: predicated region fallthrough
CT: control target
= control target key end

     0   :  { %7 = vsyncpa [#allocation3], 0  ;;  %s158_s0 = inlined_call_operand.hbm [shape: f32[2,256], index: 0, kind: input, shape index: {}]   ;;  %s159_s1 = inlined_call_operand.vmem [shape: f32[1,256], index: 1, kind: input, shape index: {}]   ;;  %s160_s2 = inlined_call_operand.hbm [shape: f32[2,256], index: 2, kind: output, shape index: {}]  }
   0x1   :  { %8 = vsyncpa [#allocation4], 0  ;;  %s113_s9 = smov [#allocation2]   ;;  %s65_s13 = scalar_lea.hbm %s158_s0, 64 }
   0x2   :  { %s15_s10 = sshll.u32 %s113_s9, 4  ;;  %p66_p0 = scmp.ne.s32.totalorder %s158_s0, %s65_s13  ;;  %s16_s10 = int_to_ptr.vmem [resolvable:$true] %s15_s10 }
   0x3   :  { %p69_p1 = scmp.lt.u32.totalorder %s65_s13, %s158_s0 }
   0x5   :  { %p71_p2 = pnand %p69_p1, %p66_p0 }
   0x7   :  { %74 = shalt.err (!%p71_p2)
}
   0x8   :  { %s75_s18 = scalar_lea.vmem %s16_s10, 64  ;;  %p80_p4 = scmp.lt.s32.totalorder %s16_s10, %s16_s10 }
   0x9   :  { %p76_p3 = scmp.ne.s32.totalorder %s16_s10, %s75_s18  ;;  %p81_p5 = scmp.lt.s32.totalorder %s75_s18, %s75_s18 }
   0xb   :  { %p82_p6 = por %p81_p5, %p80_p4 }
   0xd   :  { %p83_p7 = pnand %p82_p6, %p76_p3 }
   0xf   :  { %86 = shalt.err (!%p83_p7)
}
  0x10   :  { %18 = dma.hbm_to_vmem [thread:$0]  %s158_s0, 64, %s16_s10, [#allocation3]  }
  0x11   :  { %109 = dma.done.wait [#allocation3], 64  }
  0x12   :  { %110 = vsyncadd [#allocation3], 4294967232  ;;  %v28_v0 = vlaneseq  ;;  %v114_v1 = vmov 1983009808   ;;  %v24_v7 = vld [vmem:[#allocation2] sm:$0xf] }
  0x13   :  { %v38_v2 = vunpack.c.l.s4 %v114_v1  ;;  %v25_v8 = vld [vmem:[%s159_s1] sm:$0x3]  ;;  %v26_v12 = vmul.f32 5.656854, %v24_v7  ;;  %s115_s0 = smov [#allocation5]  }
  0x14   :  { %v29_v3 = vshrl.u32 %v28_v0, 7  ;;  %s53_s23 = sshll.u32 %s115_s0, 4  ;;  %s54_s23 = int_to_ptr.vmem [resolvable:$true] %s53_s23 }
  0x15   :  { %v39_v6 = vunpack.c.0.s8 %v38_v2  ;;  %s87_s24 = scalar_lea.vmem %s54_s23, 64  ;;  %p92_p9 = scmp.lt.s32.totalorder %s54_s23, %s54_s23 }
  0x16   :  { %v30_v4 = vsub.s32 0, %v29_v3  ;;  %v34_v5 = vsub.s32 1, %v29_v3  ;;  %p88_p8 = scmp.ne.s32.totalorder %s54_s23, %s87_s24  ;;  %p93_p10 = scmp.lt.s32.totalorder %s87_s24, %s87_s24 }
  0x17   :  { %v42_v11 = vsub.s32 %v39_v6, %v29_v3 }
  0x18   :  { %v31_v9 = vrot.slane %v25_v8, %v30_v4  ;;  %v35_v10 = vrot.slane %v25_v8, %v34_v5  ;;  %p94_p11 = por %p93_p10, %p92_p9 }
  0x1a   :  { %v36_v13 = vcombine.low %v31_v9, %v35_v10  ;;  %p95_p12 = pnand %p94_p11, %p88_p8 }
  0x1c   :  { %v43_v14 = vrot.slane %v36_v13, %v42_v11 }
  0x1e   :  { %v45_v15 = vadd.f32 %v43_v14, %v26_v12 }
  0x20   :  { %46 = vst [vmem:[#allocation5] sm:$0xf] %v45_v15 }
  0x21   :  { %98 = shalt.err (!%p95_p12)
}
  0x22   :  { %s99_s26 = scalar_lea.hbm %s160_s2, 64 }
  0x23   :  { %p100_p13 = scmp.ne.s32.totalorder %s160_s2, %s99_s26  ;;  %p103_p0 = scmp.lt.u32.totalorder %s99_s26, %s160_s2 }
  0x25   :  { %p105_p1 = pnand %p103_p0, %p100_p13 }
  0x27   :  { %108 = shalt.err (!%p105_p1)
}
  0x28   :  { %56 = dma.vmem_to_hbm [thread:$0]  %s54_s23, 64, %s160_s2, [#allocation4]  }
  0x29   :  { %111 = dma.done.wait [#allocation4], 64  }
  0x2a   :  { %112 = vsyncadd [#allocation4], 4294967232 }
  0x2b   :  { %60 = vsyncpa [#allocation3], 1 }
  0x2c   :  { %61 = vsyncpa [#allocation4], 1 }

</bundles_post_ra>
